<compile_context>
chip_gen: v7x
topology: tpu7x:2x2x1
jax: 0.10.0
libtpu: 0.0.40
codegen_flags: <defaults>
</compile_context>

<pallas_src>
import math
import jax
import jax.numpy as jnp
from jax import lax
from jax.experimental import pallas as pl
from jax.experimental.pallas import tpu as pltpu


def make_mha_kernel(q_tile, head_dim, compute_dtype):
    D = head_dim
    scale = 1.0 / math.sqrt(D)
    # Contract the last dim of both operands (a @ b.T without materializing b.T).
    dn_nt = (((1,), (1,)), ((), ()))

    def mha_kernel(x_ref, wqkv_ref, o_ref, q_cache, k_cache, v_cache):
        qi = pl.program_id(2)

        # ---- once per (batch, head): project the whole sequence and cache ----
        @pl.when(qi == 0)
        def _project_and_cache():
            x_full = x_ref[0]                        # (S, E)  compute_dtype
            w_qkv = wqkv_ref[0]                      # (3D, E) rows = [q | k | v]
            qkv = lax.dot_general(x_full, w_qkv, dn_nt,
                                  preferred_element_type=jnp.float32)  # (S, 3D)
            # Fold 1/sqrt(D) into Q once here (never touches the (TQ,S) scores).
            q_cache[...] = (qkv[:, :D] * scale).astype(compute_dtype)
            k_cache[...] = qkv[:, D:2 * D].astype(compute_dtype)
            v_cache[...] = qkv[:, 2 * D:].astype(compute_dtype)

        # ---- every step: attention for one (head, query-tile) ----
        row0 = pl.multiple_of(qi * q_tile, q_tile)
        q = q_cache[pl.ds(row0, q_tile), :]          # (TQ, D) pre-scaled, bf16
        k = k_cache[...]                             # (S,  D)
        v = v_cache[...]                             # (S,  D)

        s = lax.dot_general(q, k, dn_nt, preferred_element_type=jnp.float32)  # (TQ, S)
        s = s - jnp.max(s, axis=-1, keepdims=True)   # f32 softmax numerics
        p = jnp.exp(s)                               # un-normalized probabilities
        l = jnp.sum(p, axis=-1, keepdims=True)       # (TQ, 1)

        ctx = jnp.dot(p.astype(compute_dtype), v,
                      preferred_element_type=jnp.float32)                      # (TQ, D)
        # Deferred normalization on (TQ, D) instead of (TQ, S); EUP reciprocal.
        ctx = ctx * pl.reciprocal(l, approx=True)

        o_ref[0, 0] = ctx.astype(o_ref.dtype)

    return mha_kernel


def _vmem_footprint_bytes(S, E, D, q_tile, c_item, o_item):
    """Rough per-step VMEM footprint (buffers, caches, live f32 temporaries)."""
    return (2 * S * E * c_item            # full-sequence x block (double-buffered)
            + 2 * 3 * D * E * c_item      # stacked per-head W_qkv (double-buffered)
            + 3 * S * D * c_item          # persistent Q/K/V caches
            + S * 3 * D * 4               # f32 (S, 3D) projection temporary
            + 3 * q_tile * S * 4          # ~3 live (TQ, S) f32 temporaries
            + 2 * q_tile * D * o_item     # output block (double-buffered)
            + q_tile * D * 4)             # f32 ctx


def multihead_attention(x, wq, wk, wv, wo, bo, heads, *,
                        compute_dtype=jnp.bfloat16, q_tile=None):
    """x: (B, S, E); wq/wk/wv/wo: (E, E) PyTorch (out,in) layout; bo: (E,)."""
    B, S, E = x.shape
    D = E // heads
    assert heads * D == E

    cdt = compute_dtype
    c_item = jnp.dtype(cdt).itemsize
    o_item = 4  # kernel writes f32 context

    # ---- query-tile selection: biggest tile that fits a ~40 MiB VMEM budget ----
    vmem_budget = 40 * 1024 * 1024
    if q_tile is None:
        candidates = [t for t in (512, 256, 128) if S % t == 0 and S > t]
        q_tile = S
        if candidates:
            q_tile = candidates[-1]
            for t in candidates:
                if _vmem_footprint_bytes(S, E, D, t, c_item, o_item) <= vmem_budget:
                    q_tile = t
                    break
    assert S % q_tile == 0 and (q_tile % 8 == 0 or q_tile == S)
    n_q = S // q_tile

    # ---- wrapper-side (free) layout work ----
    x_c = x.astype(cdt)
    # Stacked per-head QKV weights: wqkv[h] = [Wq_h; Wk_h; Wv_h] -> (H, 3D, E).
    wqkv = jnp.concatenate([wq.reshape(heads, D, E),
                            wk.reshape(heads, D, E),
                            wv.reshape(heads, D, E)], axis=1).astype(cdt)

    # Full-sequence x block: its index only changes with b.  Single-buffer it
    # when the double-buffered footprint would be large (v7x has 64 MiB VMEM).
    x_index = lambda b, h, qi: (b, 0, 0)
    if 2 * S * E * c_item > 16 * 1024 * 1024:
        x_spec = pl.BlockSpec((1, S, E), x_index, pipeline_mode=pl.Buffered(1))
    else:
        x_spec = pl.BlockSpec((1, S, E), x_index)

    # Honest VMEM estimate with headroom, capped well below v7x's 64 MiB.
    vmem_est = _vmem_footprint_bytes(S, E, D, q_tile, c_item, o_item)
    vmem_limit = None
    if vmem_est > 12 * 1024 * 1024:
        vmem_limit = min(int(vmem_est * 1.4), 48 * 1024 * 1024)

    # Cost estimate reflecting the actual streaming pattern:
    #   flops: QKV projection (once per (b,h)) + attention; fc_out runs in XLA.
    flops = 6 * B * S * E * E + 4 * B * S * S * E
    transcendentals = B * heads * S * S
    bytes_accessed = (B * S * E * c_item                 # x DMA'd once per batch elem
                      + B * heads * 3 * D * E * c_item   # weights once per (b, h)
                      + B * S * E * o_item)              # f32 context written once

    kernel = make_mha_kernel(q_tile, D, cdt)

    ctx = pl.pallas_call(
        kernel,
        out_shape=jax.ShapeDtypeStruct((B, heads, S, D), jnp.float32),
        grid_spec=pltpu.PrefetchScalarGridSpec(
            num_scalar_prefetch=0,
            # q-tile axis innermost so the per-(b,h) Q/K/V caches are reused
            # across tiles; b and h are independent ("parallel") for megacore.
            grid=(B, heads, n_q),
            in_specs=[
                x_spec,                                                  # x (full seq)
                pl.BlockSpec((1, 3 * D, E), lambda b, h, qi: (h, 0, 0)), # stacked W_qkv
            ],
            out_specs=pl.BlockSpec((1, 1, q_tile, D),
                                   lambda b, h, qi: (b, h, qi, 0)),
            scratch_shapes=[pltpu.VMEM((S, D), cdt),    # Q cache (pre-scaled)
                            pltpu.VMEM((S, D), cdt),    # K cache
                            pltpu.VMEM((S, D), cdt)],   # V cache
        ),
        compiler_params=pltpu.CompilerParams(
            dimension_semantics=("parallel", "parallel", "arbitrary"),
            vmem_limit_bytes=vmem_limit,
        ),
        cost_estimate=pl.CostEstimate(flops=flops,
                                      transcendentals=transcendentals,
                                      bytes_accessed=bytes_accessed),
    )(x_c, wqkv)

    # Merge heads and apply fc_out (+ bias) as a full-width XLA GEMM (per review).
    ctx = ctx.transpose(0, 2, 1, 3).reshape(B, S, E)
    out = jnp.dot(ctx, wo.T) + bo
    return out.astype(x.dtype)


def reference_mha(x, wq, wk, wv, wo, bo, heads):
    """Pure-JAX f32 reference matching the PyTorch forward exactly."""
    B, S, E = x.shape
    D = E // heads
    Q = x @ wq.T
    K = x @ wk.T
    V = x @ wv.T
    Q = Q.reshape(B, S, heads, D).transpose(0, 2, 1, 3)          # (B, H, S, D)
    K = K.reshape(B, S, heads, D).transpose(0, 2, 3, 1)          # (B, H, D, S)
    V = V.reshape(B, S, heads, D).transpose(0, 2, 1, 3)          # (B, H, S, D)
    scores = (Q @ K) / math.sqrt(D)                              # (B, H, S, S)
    probs = jax.nn.softmax(scores, axis=-1)
    out = probs @ V                                              # (B, H, S, D)
    out = out.transpose(0, 2, 1, 3).reshape(B, S, E)
    return out @ wo.T + bo


def _make_params(key, E):
    kq, kk, kv, ko, kb = jax.random.split(key, 5)
    # PyTorch nn.Linear default init: U(-1/sqrt(in), 1/sqrt(in)), W shape (out, in).
    bound = 1.0 / math.sqrt(E)
    wq = jax.random.uniform(kq, (E, E), jnp.float32, -bound, bound)
    wk = jax.random.uniform(kk, (E, E), jnp.float32, -bound, bound)
    wv = jax.random.uniform(kv, (E, E), jnp.float32, -bound, bound)
    wo = jax.random.uniform(ko, (E, E), jnp.float32, -bound, bound)
    bo = jax.random.uniform(kb, (E,), jnp.float32, -bound, bound)
    return wq, wk, wv, wo, bo


if __name__ == "__main__":
    key = jax.random.PRNGKey(0)
    k1, k2, kp1, kp2 = jax.random.split(key, 4)

    # Case 1: small shapes consistent with the module (single query tile).
    B, S, E, H = 2, 8, 32, 4
    x = jax.random.normal(k1, (B, S, E), dtype=jnp.float32)
    wq, wk, wv, wo, bo = _make_params(kp1, E)
    out = jax.block_until_ready(multihead_attention(x, wq, wk, wv, wo, bo, H))
    ref = reference_mha(x, wq, wk, wv, wo, bo, H)
    assert out.shape == (B, S, E)
    # bf16 MXU operands (f32 accumulation / f32 softmax) -> loosened tolerance.
    assert jnp.allclose(out, ref, atol=5e-2, rtol=5e-2), "case 1 mismatch vs reference"

    # Case 2: multiple query tiles (exercises the persistent Q/K/V cache reuse).
    B2, S2, E2, H2 = 1, 256, 128, 2
    x2 = jax.random.normal(k2, (B2, S2, E2), dtype=jnp.float32)
    wq2, wk2, wv2, wo2, bo2 = _make_params(kp2, E2)
    out2 = jax.block_until_ready(multihead_attention(x2, wq2, wk2, wv2, wo2, bo2, H2))
    ref2 = reference_mha(x2, wq2, wk2, wv2, wo2, bo2, H2)
    assert out2.shape == (B2, S2, E2)
    assert jnp.allclose(out2, ref2, atol=5e-2, rtol=5e-2), "case 2 mismatch vs reference"

    print("KERNEL_OK")
</pallas_src>

<mosaic_0001>
module attributes {stable_mosaic.version = 11 : i64} {
  func.func @mha_kernel(%arg0: i32, %arg1: i32, %arg2: i32, %arg3: memref<1x8x32xbf16, #tpu.memory_space<vmem>>, %arg4: memref<1x24x32xbf16, #tpu.memory_space<vmem>>, %arg5: memref<1x1x8x8xf32, #tpu.memory_space<vmem>>, %arg6: memref<8x8xbf16, #tpu.memory_space<vmem>>, %arg7: memref<8x8xbf16, #tpu.memory_space<vmem>>, %arg8: memref<8x8xbf16, #tpu.memory_space<vmem>>) attributes {dimension_semantics = [#tpu.dimension_semantics<parallel>, #tpu.dimension_semantics<parallel>, #tpu.dimension_semantics<arbitrary>], iteration_bounds = array<i64: 2, 4, 1>, scalar_prefetch = 0 : i64, scratch_operands = 3 : i64, tpu.core_type = #tpu.core_type<tc>, window_params = [{transform_indices = @transform_0, window_bounds = array<i64: 1, 8, 32>}, {transform_indices = @transform_1, window_bounds = array<i64: 1, 24, 32>}, {transform_indices = @transform_2, window_bounds = array<i64: 1, 1, 8, 8>}]} {
    %c0_i32 = arith.constant 0 : i32
    %0 = arith.cmpi eq, %arg2, %c0_i32 : i32
    %1 = arith.extui %0 : i1 to i32
    %c0_i32_0 = arith.constant 0 : i32
    %2 = arith.cmpi ne, %1, %c0_i32_0 : i32
    scf.if %2 {
      %c0_12 = arith.constant 0 : index
      %c0_13 = arith.constant 0 : index
      %c0_14 = arith.constant 0 : index
      %25 = vector.load %arg3[%c0_12, %c0_13, %c0_14] : memref<1x8x32xbf16, #tpu.memory_space<vmem>>, vector<1x8x32xbf16>
      %26 = vector.shape_cast %25 : vector<1x8x32xbf16> to vector<8x32xbf16>
      %c0_15 = arith.constant 0 : index
      %c0_16 = arith.constant 0 : index
      %c0_17 = arith.constant 0 : index
      %27 = vector.load %arg4[%c0_15, %c0_16, %c0_17] : memref<1x24x32xbf16, #tpu.memory_space<vmem>>, vector<1x24x32xbf16>
      %28 = vector.shape_cast %27 : vector<1x24x32xbf16> to vector<24x32xbf16>
      %cst_18 = arith.constant dense<0.000000e+00> : vector<8x24xf32>
      %29 = tpu.matmul %26, %28, %cst_18 {dimension_numbers = #tpu.dot_dimension_numbers<[1], [1], [0], [0], [0, 0, 1, 0], [], []>} : vector<8x32xbf16>, vector<24x32xbf16>, vector<8x24xf32> -> vector<8x24xf32>
      %30 = vector.extract_strided_slice %29 {offsets = [0, 0], sizes = [8, 8], strides = [1, 1]} : vector<8x24xf32> to vector<8x8xf32>
      %cst_19 = arith.constant 0.353553385 : f32
      %31 = vector.broadcast %cst_19 : f32 to vector<8x8xf32>
      %32 = arith.mulf %30, %31 : vector<8x8xf32>
      %33 = arith.truncf %32 : vector<8x8xf32> to vector<8x8xbf16>
      %c0_20 = arith.constant 0 : index
      %c0_21 = arith.constant 0 : index
      %34 = vector.load %arg6[%c0_20, %c0_21] : memref<8x8xbf16, #tpu.memory_space<vmem>>, vector<8x8xbf16>
      tpu.vector_store %arg6[%c0_20, %c0_21], %33 {strides = array<i32>} : memref<8x8xbf16, #tpu.memory_space<vmem>>, vector<8x8xbf16>,
      %35 = vector.extract_strided_slice %29 {offsets = [0, 8], sizes = [8, 8], strides = [1, 1]} : vector<8x24xf32> to vector<8x8xf32>
      %36 = arith.truncf %35 : vector<8x8xf32> to vector<8x8xbf16>
      %c0_22 = arith.constant 0 : index
      %c0_23 = arith.constant 0 : index
      %37 = vector.load %arg7[%c0_22, %c0_23] : memref<8x8xbf16, #tpu.memory_space<vmem>>, vector<8x8xbf16>
      tpu.vector_store %arg7[%c0_22, %c0_23], %36 {strides = array<i32>} : memref<8x8xbf16, #tpu.memory_space<vmem>>, vector<8x8xbf16>,
      %38 = vector.extract_strided_slice %29 {offsets = [0, 16], sizes = [8, 8], strides = [1, 1]} : vector<8x24xf32> to vector<8x8xf32>
      %39 = arith.truncf %38 : vector<8x8xf32> to vector<8x8xbf16>
      %c0_24 = arith.constant 0 : index
      %c0_25 = arith.constant 0 : index
      %40 = vector.load %arg8[%c0_24, %c0_25] : memref<8x8xbf16, #tpu.memory_space<vmem>>, vector<8x8xbf16>
      tpu.vector_store %arg8[%c0_24, %c0_25], %39 {strides = array<i32>} : memref<8x8xbf16, #tpu.memory_space<vmem>>, vector<8x8xbf16>,
    } else {
    }
    %c8_i32 = arith.constant 8 : i32
    %3 = arith.muli %arg2, %c8_i32 : i32
    %4 = tpu.assume_multiple %3, 8 : i32
    %5 = arith.index_cast %4 : i32 to index
    %c0 = arith.constant 0 : index
    %6 = vector.load %arg6[%5, %c0] : memref<8x8xbf16, #tpu.memory_space<vmem>>, vector<8x8xbf16>
    %c0_1 = arith.constant 0 : index
    %c0_2 = arith.constant 0 : index
    %7 = vector.load %arg7[%c0_1, %c0_2] : memref<8x8xbf16, #tpu.memory_space<vmem>>, vector<8x8xbf16>
    %c0_3 = arith.constant 0 : index
    %c0_4 = arith.constant 0 : index
    %8 = vector.load %arg8[%c0_3, %c0_4] : memref<8x8xbf16, #tpu.memory_space<vmem>>, vector<8x8xbf16>
    %cst = arith.constant dense<0.000000e+00> : vector<8x8xf32>
    %9 = tpu.matmul %6, %7, %cst {dimension_numbers = #tpu.dot_dimension_numbers<[1], [1], [0], [0], [0, 0, 1, 0], [], []>} : vector<8x8xbf16>, vector<8x8xbf16>, vector<8x8xf32> -> vector<8x8xf32>
    %cst_5 = arith.constant dense<0xFF800000> : vector<8xf32>
    %10 = vector.multi_reduction <maximumf>, %9, %cst_5 [1] : vector<8x8xf32> to vector<8xf32>
    %11 = vector.shape_cast %10 : vector<8xf32> to vector<8x1xf32>
    %12 = vector.broadcast %11 : vector<8x1xf32> to vector<8x8xf32>
    %13 = arith.subf %9, %12 : vector<8x8xf32>
    %14 = math.exp %13 : vector<8x8xf32>
    %cst_6 = arith.constant dense<0.000000e+00> : vector<8xf32>
    %15 = vector.multi_reduction <add>, %14, %cst_6 [1] : vector<8x8xf32> to vector<8xf32>
    %16 = vector.shape_cast %15 : vector<8xf32> to vector<8x1xf32>
    %17 = arith.truncf %14 : vector<8x8xf32> to vector<8x8xbf16>
    %cst_7 = arith.constant dense<0.000000e+00> : vector<8x8xf32>
    %18 = tpu.matmul %17, %8, %cst_7 {dimension_numbers = #tpu.dot_dimension_numbers<[1], [0], [0], [1], [0, 0, 1, 1], [], []>} : vector<8x8xbf16>, vector<8x8xbf16>, vector<8x8xf32> -> vector<8x8xf32>
    %19 = tpu.reciprocal %16 {approx = true} : vector<8x1xf32> -> vector<8x1xf32>
    %20 = vector.broadcast %19 : vector<8x1xf32> to vector<8x8xf32>
    %21 = arith.mulf %18, %20 : vector<8x8xf32>
    %c0_8 = arith.constant 0 : index
    %c0_9 = arith.constant 0 : index
    %c0_10 = arith.constant 0 : index
    %c0_11 = arith.constant 0 : index
    %22 = vector.load %arg5[%c0_8, %c0_9, %c0_10, %c0_11] : memref<1x1x8x8xf32, #tpu.memory_space<vmem>>, vector<1x1x8x8xf32>
    %23 = vector.shape_cast %22 : vector<1x1x8x8xf32> to vector<8x8xf32>
    %24 = vector.shape_cast %21 : vector<8x8xf32> to vector<1x1x8x8xf32>
    tpu.vector_store %arg5[%c0_8, %c0_9, %c0_10, %c0_11], %24 {strides = array<i32>} : memref<1x1x8x8xf32, #tpu.memory_space<vmem>>, vector<1x1x8x8xf32>,
    return
  }
  func.func @transform_0(%arg0: i32, %arg1: i32, %arg2: i32) -> (i32, i32, i32) {
    %c0_i32 = arith.constant 0 : i32
    %c0_i32_0 = arith.constant 0 : i32
    %c0_i32_1 = arith.constant 0 : i32
    return %arg0, %c0_i32, %c0_i32_0 : i32, i32, i32
  }
  func.func @transform_1(%arg0: i32, %arg1: i32, %arg2: i32) -> (i32, i32, i32) {
    %c0_i32 = arith.constant 0 : i32
    %c0_i32_0 = arith.constant 0 : i32
    %c0_i32_1 = arith.constant 0 : i32
    return %arg1, %c0_i32, %c0_i32_0 : i32, i32, i32
  }
  func.func @transform_2(%arg0: i32, %arg1: i32, %arg2: i32) -> (i32, i32, i32, i32) {
    %c0_i32 = arith.constant 0 : i32
    %c0_i32_0 = arith.constant 0 : i32
    return %arg0, %arg1, %arg2, %c0_i32 : i32, i32, i32, i32
  }
}

</mosaic_0001>

<bundles_post_ra>
// kernel: tpu_custom_call.1
= control target key start
LH: loop header
LB: loop body
LE: loop exit
PB: predicated region body
PF: predicated region fallthrough
CT: control target
= control target key end

     0   :  { %s1306_s0 = inlined_call_operand.hbm [shape: bf16[2,8,32], index: 0, kind: input, shape index: {}]   ;;  %s1307_s1 = inlined_call_operand.hbm [shape: bf16[4,24,32], index: 1, kind: input, shape index: {}]   ;;  %s1308_s2 = inlined_call_operand.hbm [shape: f32[2,4,8,8], index: 2, kind: output, shape index: {}]  }
   0x1   :  { %1320 = sst [smem:[#allocation20_spill]] %s1306_s0 }
   0x2   :  { %1321 = sst [smem:[#allocation21_spill]] %s1308_s2 }
   0x3   :  { %7 = vsyncpa [#allocation6], 0 }
   0x4   :  { %9 = vsyncpa [#allocation6 + $0x1], 0 }
   0x5   :  { %10 = vsyncpa [#allocation9], 0 }
   0x6   :  { %12 = vsyncpa [#allocation9 + $0x1], 0 }
   0x7   :  { %13 = vsyncpa [#allocation7], 0 }
   0x8   :  { %15 = vsyncpa [#allocation7 + $0x1], 0  ;;  %s980_s9 = smov 0   ;;  %s982_s10 = smov 0  }
   0x9   :  { %s984_s11 = smov 0   ;;  %s986_s12 = smov 0  }
   0xa   :  { %s988_s13 = smov 0   ;;  %s990_s14 = smov 0  }
   0xb   :  { %s992_s15 = smov 0   ;;  %s994_s16 = smov 0  }
   0xc   :  { %s996_s17 = smov 0   ;;  %s998_s18 = smov 0  }
   0xd   :  { %s1000_s19 = smov 0   ;;  %s1002_s20 = smov 0  }
   0xe   :  { %s1004_s21 = smov 0   ;;  %s1006_s22 = smov 0  }
   0xf LB: > { %1322 = sst [smem:[#allocation14_spill]] %s902_s9  ;;  %s549_s23 = sadd.s32 4294967295, %s954_s22   ;;  %s954_s22 = sphi %s1006_s22, %s21_s22   ;;  %s950_s21 = sphi %s1004_s21, %s1352_s21   ;;  %s946_s20 = sphi %s1002_s20, %s1365_s20   ;;  %s942_s19 = sphi %s1000_s19, %s1364_s19   ;;  %s938_s18 = sphi %s998_s18, %s1363_s18   ;;  %s934_s17 = sphi %s996_s17, %s1362_s17   ;;  %s930_s16 = sphi %s994_s16, %s1361_s16   ;;  %s926_s15 = sphi %s992_s15, %s1360_s15   ;;  %s922_s14 = sphi %s990_s14, %s1359_s14   ;;  %s918_s13 = sphi %s988_s13, %s1358_s13   ;;  %s914_s12 = sphi %s986_s12, %s1357_s12   ;;  %s910_s11 = sphi %s984_s11, %s1356_s11   ;;  %s906_s10 = sphi %s982_s10, %s1355_s10   ;;  %s902_s9 = sphi %s980_s9, %s1354_s9  }
  0x10   : > { %1323 = sst [smem:[#allocation15_spill]] %s950_s21  ;;  %s550_s24 = sadd.s32 4294967294, %s954_s22  }
  0x11   : > { %1324 = sst [smem:[#allocation16_spill]] %s954_s22  ;;  %p54_p0 = scmp.ne.s32.totalorder %s934_s17, %s930_s16 }
  0x12   : > { %p55_p1 = scmp.eq.s32.totalorder %s954_s22, 0  ;;  %p60_p2 = scmp.ne.s32.totalorder %s930_s16, %s926_s15 }
  0x13   : > { %p61_p3 = scmp.eq.s32.totalorder %s549_s23, 0  ;;  %p80_p5 = scmp.ne.s32.totalorder %s922_s14, %s918_s13 }
  0x14   : > { %p1054_p4 = por %p55_p1, %p54_p0  ;;  %p86_p7 = scmp.ne.s32.totalorder %s918_s13, %s914_s12 }
  0x15   : > { %p1060_p6 = por %p61_p3, %p60_p2  ;;  %p1065_p8 = por %p80_p5, %p55_p1 }
  0x16   : > { %p113_p9 = scmp.ne.s32.totalorder %s910_s11, %s906_s10  ;;  %p1071_p10 = por %p86_p7, %p61_p3 }
  0x17   : > { %s1326_s28 = scalar_select %p1060_p6, 1, 0 }
  0x18   : > { %s1328_s30 = scalar_select %p1071_p10, 1, 0 }
  0x19   : > { %p114_p11 = scmp.eq.s32.totalorder %s549_s23, 7  ;;  %p119_p12 = scmp.ne.s32.totalorder %s906_s10, %s902_s9 }
  0x1a   : > { %p120_p13 = scmp.eq.s32.totalorder %s550_s24, 7  ;;  %p618_p1 = scmp.lt.s32.totalorder %s954_s22, 8 }
  0x1b   : > { %p1077_p0 = por %p114_p11, %p113_p9  ;;  %s140_s5 = sand.u32 1, %s934_s17  }
  0x1c   : > { %p1081_p2 = por %p120_p13, %p119_p12  ;;  %s554_s6 = sshll.u32 %s950_s21, 6 }
  0x1d   : > { %s1329_s3 = scalar_select %p1077_p0, 1, 0 }
  0x1e   : > { %s1330_s4 = scalar_select %p1081_p2, 1, 0 }
  0x1f   : > { %s553_s7 = sshll.u32 %s140_s5, 2  ;;  %s1332_s0 = sld [smem:[#allocation20_spill]] }
  0x20   : > { %1331 = sst [smem:[#allocation17_spill]] %s1330_s4  ;;  %s144_s23 = scalar_lea.vmem [#allocation5], %s553_s7 }
  0x21   : > { %s151_s24 = sshll.u32 %s144_s23, 4  ;;  %p1095_p3 = pnand %p618_p1, %p1054_p4  ;;  %s1099_s24 = int_to_ptr.vmem [resolvable:$true] %s151_s24 }
  0x22   : > { %p1103_p5 = pnand %p618_p1, %p1065_p8 }
  0x23   : > { %p746_p11 = pneg %p1095_p3 }
  0x25   : > { %s1091_s15 = scalar_lea.hbm %s1332_s0, %s554_s6  ;;  %s141_s6 = scalar_lea.sflag [#allocation6], %s140_s5 }
  0x26   : > { %s744_s12 = scalar_lea.hbm %s1091_s15, 64  ;;  %s749_s23 = scalar_lea.hbm %s1332_s0, 128 }
  0x27   : > { %p745_p9 = scmp.ne.s32.totalorder %s1091_s15, %s744_s12  ;;  %p750_p8 = scmp.lt.u32.totalorder %s1091_s15, %s1332_s0 }
  0x28   : > { %p751_p13 = scmp.lt.u32.totalorder %s749_s23, %s744_s12  ;;  %p753_p7 = scmp.lt.u32.totalorder %s744_s12, %s1091_s15 }
  0x29   : > { %p747_p4 = pnand %p746_p11, %p745_p9 }
  0x2a   : > { %p752_p1 = por %p751_p13, %p750_p8 }
  0x2b   : > { %p748_p12 = pneg %p747_p4 }
  0x2c   : > { %p754_p2 = por %p753_p7, %p752_p1 }
  0x2e   : > { %p755_p0 = pnand %p754_p2, %p748_p12 }
  0x30   : > { %758 = shalt.err (!%p755_p0)
}
  0x31   : > { %s759_s5 = scalar_lea.vmem %s1099_s24, 64  ;;  %s956_s27 = smov [#allocation5]  }
  0x32   : > { %p760_p9 = scmp.ne.s32.totalorder %s1099_s24, %s759_s5  ;;  %s764_s7 = sshll.u32 %s956_s27, 4  ;;  %s765_s7 = int_to_ptr.vmem [resolvable:$false] %s764_s7 }
  0x33   : > { %s766_s25 = scalar_lea.vmem %s765_s7, 128  ;;  %p767_p6 = scmp.lt.s32.totalorder %s1099_s24, %s765_s7 }
  0x34   : > { %p762_p4 = pnand %p760_p9, %p746_p11  ;;  %p768_p8 = scmp.lt.s32.totalorder %s766_s25, %s759_s5 }
  0x36   : > { %p763_p10 = pneg %p762_p4  ;;  %p769_p13 = por %p768_p8, %p767_p6 }
  0x38   : > { %p770_p7 = pnand %p769_p13, %p763_p10 }
  0x3a   : > { %773 = shalt.err (!%p770_p7)
}
  0x3b   : > { %610 = dma.hbm_to_vmem [thread:$0]  (!%p1095_p3), %s1091_s15, 64, %s1099_s24, %s141_s6  }
  0x3c   : > { %p177_p0 = scmp.lt.s32.totalorder %s954_s22, 9  ;;  %s73_s12 = sadd.s32 1, %s922_s14 }
  0x3d   : > { %p1335_p6 = scmp.ge.s32.totalorder %s954_s22, 1  ;;  %s36_s26 = sadd.s32 1, %s946_s20 }
  0x3e   : > { %s103_s29 = sadd.s32 1, %s910_s11  ;;  %p38_p2 = scmp.ge.s32.totalorder %s36_s26, 4 }
  0x3f   : > { %p1137_p10 = pnand %p1335_p6, %p177_p0  ;;  %s158_s5 = sand.u32 1, %s922_s14  }
  0x40   : > { %s598_s27 = smul.u32 12, %s158_s5  ;;  %s1367_s26 = smov (%p38_p2, %s36_s26), 0 }
  0x41   : > { %1337 = sst [smem:[#allocation18_spill]] %s1367_s26  ;;  %s1338_s7 = sadd.s32 1, %s950_s21 }
  0x42   : > { %s1369_s7 = smov (!%p38_p2, %s1338_s7), %s950_s21  ;;  %s70_s15 = ssub.s32 %s946_s20, %s1367_s26 }
  0x43   : > { %p42_p3 = scmp.ge.s32.totalorder %s1369_s7, 2  ;;  %p71_p11 = scmp.eq.s32.totalorder %s70_s15, 0 }
  0x44   : > { %s599_s24 = smul.u32 192, %s946_s20  ;;  %s162_s6 = scalar_lea.vmem [#allocation8], %s598_s27 }
  0x45   : > { %s169_s25 = sshll.u32 %s162_s6, 4  ;;  %s1371_s7 = smov (%p42_p3, %s1369_s7), 0  ;;  %s1164_s25 = int_to_ptr.vmem [resolvable:$true] %s169_s25 }
  0x46   : > { %1339 = sst [smem:[#allocation19_spill]] %s1371_s7  ;;  %s44_s4 = ssub.s32 %s950_s21, %s1371_s7 }
  0x47   : > { %s1155_s0 = scalar_select %p71_p11, %s922_s14, %s73_s12  }
  0x48   : > { %s1162_s2 = scalar_lea.hbm %s1307_s1, %s599_s24  ;;  %p45_p12 = scmp.eq.s32.totalorder %s44_s4, 0 }
  0x49   : > { %s98_s26 = sor.u32 %s70_s15, %s44_s4  ;;  %s1340_s27 = sadd.s32 1, %s934_s17 }
  0x4a   : > { %p101_p1 = scmp.eq.s32.totalorder %s98_s26, 0  ;;  %s1174_s7 = scalar_lea.sflag [#allocation9], %s158_s5 }
  0x4b   : > { %s1169_s6 = scalar_select %p45_p12, %s934_s17, %s1340_s27  }
  0x4c   : > { %s1172_s12 = scalar_select %p101_p1, %s910_s11, %s103_s29  }
  0x4d   : > { %s774_s21 = scalar_lea.hbm %s1162_s2, 192  ;;  %p776_p4 = pneg %p1103_p5 }
  0x4e   : > { %p775_p9 = scmp.ne.s32.totalorder %s1162_s2, %s774_s21  ;;  %s779_s4 = scalar_lea.hbm %s1307_s1, 768 }
  0x4f   : > { %p780_p7 = scmp.lt.u32.totalorder %s1162_s2, %s1307_s1  ;;  %p781_p0 = scmp.lt.u32.totalorder %s779_s4, %s774_s21 }
  0x50   : > { %p777_p8 = pnand %p776_p4, %p775_p9  ;;  %p783_p2 = scmp.lt.u32.totalorder %s774_s21, %s1162_s2 }
  0x51   : > { %p782_p6 = por %p781_p0, %p780_p7 }
  0x52   : > { %p778_p13 = pneg %p777_p8 }
  0x53   : > { %p784_p3 = por %p783_p2, %p782_p6 }
  0x55   : > { %p785_p11 = pnand %p784_p3, %p778_p13 }
  0x57   : > { %788 = shalt.err (!%p785_p11)
}
  0x58   : > { %s789_s29 = scalar_lea.vmem %s1164_s25, 192  ;;  %s957_s5 = smov [#allocation8]  }
  0x59   : > { %p790_p12 = scmp.ne.s32.totalorder %s1164_s25, %s789_s29  ;;  %s794_s24 = sshll.u32 %s957_s5, 4  ;;  %s795_s24 = int_to_ptr.vmem [resolvable:$false] %s794_s24 }
  0x5a   : > { %s796_s27 = scalar_lea.vmem %s795_s24, 384  ;;  %p797_p8 = scmp.lt.s32.totalorder %s1164_s25, %s795_s24 }
  0x5b   : > { %p792_p1 = pnand %p790_p12, %p776_p4  ;;  %p798_p7 = scmp.lt.s32.totalorder %s796_s27, %s789_s29 }
  0x5d   : > { %p793_p9 = pneg %p792_p1  ;;  %p799_p0 = por %p798_p7, %p797_p8 }
  0x5f   : > { %p800_p6 = pnand %p799_p0, %p793_p9 }
  0x61   : > { %803 = shalt.err (!%p800_p6)
}
  0x62   : > { %s958_s21 = smov 64   ;;  %s959_s9 = smov 4  }
  0x63   : > { %613 = dma.hbm_to_vmem [thread:$0]  (!%p1103_p5), %s1162_s2, 192, %s1164_s25, %s1174_s7, %s958_s21, %s958_s21, %s959_s9  }
  0x64   : > { %181 = sbr.rel (%p1137_p10) target bundleno = 1076 (0x434), region = 28  ;;  %s183_s22 = sand.u32 (!%p1137_p10), 1, %s930_s16  }
  0x65   : > { %s557_s4 = sshll.u32 (!%p1137_p10), %s183_s22, 2  ;;  %s184_s26 = scalar_lea.sflag (!%p1137_p10), [#allocation6], %s183_s22 }
  0x66   : > { %s187_s15 = scalar_lea.vmem (!%p1137_p10), [#allocation5], %s557_s4  ;;  %p1341_p4 = scmp.ne.s32.totalorder (!%p1137_p10), %s1326_s28, 0 }
  0x6b   : > { %889 = dma.done.wait (%p1341_p4), %s184_s26, 64  }
  0x6c   : > { %891 = vsyncadd (%p1341_p4), %s184_s26, 4294967232  ;;  %s192_s29 = sand.u32 1, %s918_s13   ;;  %p1342_p5 = scmp.ne.s32.totalorder %s1328_s30, 0 }
  0x6d   : > { %s600_s5 = smul.u32 12, %s192_s29  ;;  %s193_s8 = scalar_lea.sflag [#allocation9], %s192_s29 }
  0x6f   : > { %s196_s2 = scalar_lea.vmem [#allocation8], %s600_s5 }
  0x70   : > { %893 = dma.done.wait (%p1342_p5), %s193_s8, 192  }
  0x71   : > { %895 = vsyncadd (%p1342_p5), %s193_s8, 4294967104  ;;  %v960_v0 = vmov 0.0   ;;  %vm961_vm0 = vmmov 0   ;;  %vm239_vm1 = vcmask 261120   ;;  %v738_v1 = vld [vmem:[%s196_s2] sm:$0xff]   ;;  %vm291_vm2 = vcmask 60416  }
  0x72   : > { %578 = vmatprep.subr.bf16.mxu0 %v960_v0  ;;  %582 = vmatprep.mubr.msk.bf16.mxu0 %vm961_vm0, %v960_v0  ;;  %v244_v2 = vsel %vm239_vm1, %v738_v1, 0  ;;  %v739_v3 = vld [vmem:[%s196_s2 + $0x8] ss:$0 sps:$4 sm:$0xff]   ;;  %v227_v5 = vld [vmem:[%s187_s15] sm:$0xf]  ;;  %s962_s28 = smov 112  }
  0x73   : > { %586 = vmatprep.subr.bf16.mxu1 %v960_v0  ;;  %588 = vmatprep.mubr.msk.bf16.mxu1 %vm961_vm0, %v960_v0  ;;  %v247_v4 = vsel %vm239_vm1, %v739_v3, 0  ;;  %s963_s30 = smov 120   ;;  %vm313_vm3 = vcmask 64512   ;;  %vm373_vm4 = vcmask 1043456   ;;  %s219_s23 = sand.u32 1, %s906_s10  }
  0x74   : > { %579 = vmatpush3.bf16.xpose.msra.mxu0 %v244_v2  ;;  %s558_s7 = sshll.u32 %s219_s23, 3  ;;  %s566_s25 = sshll.u32 %s942_s19, 2 }
  0x75   : > { %580 = vmatprep.subr.bf16.mxu0 %v960_v0  ;;  %s433_s24 = sadd.s32 %s938_s18, %s566_s25  ;;  %s221_s21 = scalar_lea.vmem [#allocation10], %s558_s7 }
  0x76   : > { %s567_s27 = sshll.u32 %s433_s24, 7  ;;  %s437_s9 = sshll.u32 %s221_s21, 4  ;;  %s1230_s9 = int_to_ptr.vmem [resolvable:$true] %s437_s9 }
  0x77   : > { %s1343_s26 = sld [smem:[#allocation21_spill]]  ;;  %s421_s18 = scalar_lea.sflag [#allocation7], %s219_s23 }
  0x78   : > { %s804_s19 = scalar_lea.vmem %s1230_s9, 128  ;;  %p1344_p13 = scmp.ne.s32.totalorder %s1329_s3, 0 }
  0x79   : > { %p805_p10 = scmp.ne.s32.totalorder %s1230_s9, %s804_s19  ;;  %s964_s29 = smov [#allocation10]  }
  0x7a   : > { %s808_s5 = sshll.u32 %s964_s29, 4  ;;  %s809_s5 = int_to_ptr.vmem [resolvable:$false] %s808_s5 }
  0x7b   : > { %p806_p2 = pnand %p805_p10, %p1344_p13  ;;  %s810_s8 = scalar_lea.vmem %s809_s5, 256 }
  0x7c   : > { %581 = vmatpush3.bf16.xpose.msra.mxu0 %v247_v4  ;;  %p811_p11 = scmp.lt.s32.totalorder %s1230_s9, %s809_s5  ;;  %p812_p12 = scmp.lt.s32.totalorder %s810_s8, %s804_s19 }
  0x7d   : > { %s1228_s15 = scalar_lea.hbm %s1343_s26, %s567_s27  ;;  %p807_p3 = pneg %p806_p2 }
  0x7e   : > { %p813_p1 = por %p812_p12, %p811_p11 }
  0x80   : > { %p814_p9 = pnand %p813_p1, %p807_p3 }
  0x83   : > { %583 = vmatmul.mubr.msk.bf16.vlgmr.msra.gmra.mrb[0].mxu0 %vm239_vm1, %v227_v5 }
 0x156   : > { %v283_v6 = vpop.f32.mrb[0].mxu0 }
 0x157   : > { %v289_v7 = vmul.f32 0.35355338, %v283_v6  ;;  %v584_v8 = vpop.f32.mrb[1].mxu0  ;;  %v570_v9 = vpack.c.bf16 %v283_v6, %v283_v6 }
 0x158   : > { %v286_v10 = vpop.f32.mrb[2].mxu0 }
 0x159   : > { %v290_v11 = vpack.c.bf16 %v289_v7, %v289_v7  ;;  %301 = vrot.lane.b32.xlu1 %v570_v9, %s962_s28  ;;  %297 = vrot.lane.b32.xlu0 %v570_v9, %s963_s30  ;;  %v585_v12 = vpop.f32.mrb[3].mxu0 }
 0x15b   : > { %292 = vst.msk [vmem:[#allocation2] sm:$0xf] %vm291_vm2, %v290_v11 }
 0x162   : > { %v310_v18 = vld [vmem:[#allocation2] sm:$0xf] }
 0x1cb   : > { %v302_v13 = vpop.permute.xlu1 %301  ;;  %v298_v14 = vpop.permute.xlu0 %297 }
 0x1cc   : > { %304 = vst.msk [vmem:[#allocation4] sm:$0xf] %vm291_vm2, %v302_v13  ;;  %300 = vst.msk [vmem:[#allocation3] sm:$0xf] %vm291_vm2, %v298_v14 }
 0x1d3   : > { %v311_v15 = vld [vmem:[#allocation3] sm:$0xf]  ;;  %v312_v17 = vld [vmem:[#allocation4] sm:$0xf] }
 0x1d4   : > { %v318_v16 = vsel %vm313_vm3, %v311_v15, 0  ;;  %v375_v19 = vsel %vm373_vm4, %v312_v17, 0 }
 0x1d5   : > { %587 = vmatpush3.bf16.xpose.msra.mxu1 %v318_v16 }
 0x1d6   : > { %592 = vmatprep.subr.bf16.mxu1 %v960_v0 }
 0x1dc   : > { %589 = vmatmul.mubr.msk.bf16.vlgmr.msra.gmra.mrb[0].mxu1 %vm313_vm3, %v310_v18 }
 0x1dd   : > { %593 = vmatpush3.bf16.msra.mxu1 %v375_v19  ;;  %594 = vmatprep.mubr.msk.bf16.mxu1 %vm961_vm0, %v960_v0 }
 0x2af   : > { %v354_v20 = vpop.f32.mrb[0].mxu1 }
 0x2b0   : > { %v590_v21 = vpop.f32.mrb[1].mxu1  ;;  %v360_v22 = vsel %vm313_vm3, %v354_v20, -inf }
 0x2b1   : > { %361 = vmax.xlane.f32.xlu0 %v360_v22  ;;  %v357_v23 = vpop.f32.mrb[2].mxu1 }
 0x2b2   : > { %v591_v24 = vpop.f32.mrb[3].mxu1 }
 0x33e   : > { %v362_v25 = vpop.xlane.xlu0 %361 }
 0x33f   : > { %v363_v26 = vsub.f32 %v354_v20, %v362_v25 }
 0x341   : > { %v364_v27 = vmul.f32 1.442695, %v363_v26 }
 0x343   : > { %740 = vpow2.f32 %v364_v27 }
 0x34d   : > { %v741_v28 = vpop.eup %740 }
 0x34e   : > { %v366_v29 = vsel %vm313_vm3, %v741_v28, 0.0  ;;  %v369_v30 = vpack.c.bf16 %v741_v28, %v741_v28 }
 0x34f   : > { %367 = vadd.xlane.f32.xlu1 %v366_v29 }
 0x350   : > { %595 = vmatmul.mubr.msk.bf16.vlgmr.msra.gmra.mrb[4].mxu1 %vm313_vm3, %v369_v30 }
 0x3dc   : > { %v368_v31 = vpop.xlane.xlu1 %367 }
 0x3dd   : > { %742 = vrcp.f32 %v368_v31 }
 0x3e7   : > { %v743_v32 = vpop.eup %742 }
 0x423   : > { %v411_v33 = vpop.f32.mrb[4].mxu1 }
 0x424   : > { %v418_v34 = vmul.f32 %v743_v32, %v411_v33  ;;  %v596_v35 = vpop.f32.mrb[5].mxu1 }
 0x425   : > { %v414_v36 = vpop.f32.mrb[6].mxu1 }
 0x426   : > { %v597_v37 = vpop.f32.mrb[7].mxu1  ;;  %419 = vst.msk [vmem:[%s221_s21] sm:$0xff] %vm313_vm3, %v418_v34 }
 0x427   : > { %817 = shalt.err (!%p814_p9)
}
 0x428   : > { %s818_s2 = scalar_lea.hbm %s1228_s15, 128  ;;  %s822_s23 = scalar_lea.hbm %s1343_s26, 1024 }
 0x429   : > { %p819_p8 = scmp.ne.s32.totalorder %s1228_s15, %s818_s2  ;;  %p823_p6 = scmp.lt.u32.totalorder %s1228_s15, %s1343_s26 }
 0x42a   : > { %p824_p4 = scmp.lt.u32.totalorder %s822_s23, %s818_s2  ;;  %p826_p10 = scmp.lt.u32.totalorder %s818_s2, %s1228_s15 }
 0x42b   : > { %p820_p7 = pnand %p819_p8, %p1344_p13 }
 0x42c   : > { %p825_p5 = por %p824_p4, %p823_p6 }
 0x42d   : > { %p821_p0 = pneg %p820_p7 }
 0x42e   : > { %p827_p2 = por %p826_p10, %p825_p5 }
 0x430   : > { %p828_p3 = pnand %p827_p2, %p821_p0 }
 0x432   : > { %831 = shalt.err (!%p828_p3)
}
 0x433   : > { %605 = dma.vmem_to_hbm [thread:$0]  (%p1344_p13), %s1230_s9, 128, %s1228_s15, %s421_s18  }
 0x434 PF: > { %s1345_s24 = sld [smem:[#allocation16_spill]]  ;;  %s1346_s27 = sld [smem:[#allocation14_spill]] }
 0x435   : > { %s1347_s21 = sld [smem:[#allocation17_spill]] }
 0x43a   : > { %p619_p11 = scmp.ge.s32.totalorder %s1345_s24, 2  ;;  %s449_s22 = sand.u32 1, %s1346_s27  }
 0x43b   : > { %p1348_p12 = scmp.ne.s32.totalorder %s1347_s21, 0  ;;  %s450_s4 = scalar_lea.sflag [#allocation7], %s449_s22 }
 0x43d   : > { %p615_p1 = pnand %p619_p11, %p1348_p12 }
 0x43f   : > { %897 = dma.done.wait (!%p615_p1), %s450_s4, 128  }
 0x440   : > { %899 = vsyncadd (!%p615_p1), %s450_s4, 4294967168  ;;  %s21_s22 = sadd.s32 1, %s1345_s24   ;;  %s1350_s3 = sld [smem:[#allocation15_spill]] }
 0x441   : > { %p1259_p9 = scmp.ge.s32.totalorder %s21_s22, 10   ;;  %s1351_s29 = sld [smem:[#allocation18_spill]] }
 0x442   : > { %s1352_s21 = sld [smem:[#allocation19_spill]]  ;;  %s1354_s9 = smov %s906_s10 }
 0x443   : > { %s1355_s10 = smov %s910_s11  ;;  %s1356_s11 = smov %s1172_s12 }
 0x444   : > { %s1357_s12 = smov %s918_s13  ;;  %s1358_s13 = smov %s922_s14 }
 0x445   : > { %s1359_s14 = smov %s1155_s0  ;;  %s1360_s15 = smov %s930_s16 }
 0x446   : > { %s1361_s16 = smov %s934_s17  ;;  %s1362_s17 = smov %s1169_s6 }
 0x447   : > { %s1363_s18 = smov %s946_s20  ;;  %s1364_s19 = smov %s1350_s3 }
 0x448   : > { %s1365_s20 = smov %s1351_s29  ;;  %20 = sbr.rel (!%p1259_p9) target bundleno = 15 (0xf), region = 91 }
 0x44f   :  { %455 = vsyncpa [#allocation6], 1 }
 0x450   :  { %457 = vsyncpa [#allocation6 + $0x1], 1 }
 0x451   :  { %458 = vsyncpa [#allocation9], 1 }
 0x452   :  { %460 = vsyncpa [#allocation9 + $0x1], 1 }
 0x453   :  { %461 = vsyncpa [#allocation7], 1 }
 0x454   :  { %463 = vsyncpa [#allocation7 + $0x1], 1 }

</bundles_post_ra>
